<compile_context>
chip_gen: v5e
topology: v5e:2x2
jax: 0.10.0
libtpu: 0.0.40
codegen_flags: <defaults>
</compile_context>

<pallas_src>
import math

import jax
import jax.numpy as jnp
from jax.experimental import pallas as pl
from jax.experimental.pallas import tpu as pltpu

# ----------------------------- config ---------------------------------------
BATCH = 2
SEQ = 8
HIDDEN = 32
NUM_HEADS = 2
HEAD_DIM = HIDDEN // NUM_HEADS
INTERMEDIATE = 64
LN_EPS = 1e-12


def _layer_norm(x, gamma, beta, eps=LN_EPS):
    mu = jnp.mean(x, axis=-1, keepdims=True)
    var = jnp.mean((x - mu) ** 2, axis=-1, keepdims=True)
    return (x - mu) * jax.lax.rsqrt(var + eps) * gamma + beta


def _gelu(x):
    # TODO(synk): BERT reference uses exact erf GELU; tanh approximation kept for
    # robust Mosaic lowering (~1e-3 numerically, same fn used in the JAX reference).
    return jax.nn.gelu(x, approximate=True)


# ----------------------------- kernel ---------------------------------------
def galaxy_bert_layer_kernel(
    x_ref,        # [B*S, H]
    mask_ref,     # [B, S]   additive mask
    wqkv_ref,     # [H, 3H]
    bqkv_ref,     # [1, 3H]
    wo_ref,       # [H, H]
    w1_ref,       # [H, I]
    b1_ref,       # [1, I]
    w2_ref,       # [I, H]
    vec_ref,      # [6, H]   rows: bo, g1, be1, b2, g2, be2
    out_ref,      # [B*S, H]
):
    x = x_ref[...]                       # [B*S, H]
    mask = mask_ref[...]                 # [B, S]
    vec = vec_ref[...]                   # [6, H]
    wo = wo_ref[...]                     # [H, H]

    # --- fused Q/K/V projection: single MXU op over the flattened batch ---
    qkv = jnp.dot(x, wqkv_ref[...], preferred_element_type=jnp.float32) + bqkv_ref[...]
    q = qkv[:, 0 * HIDDEN:1 * HIDDEN]
    k = qkv[:, 1 * HIDDEN:2 * HIDDEN]
    v = qkv[:, 2 * HIDDEN:3 * HIDDEN]

    scale = 1.0 / math.sqrt(HEAD_DIM)
    attn = jnp.zeros((BATCH * SEQ, HIDDEN), jnp.float32)

    # Static unroll over heads; batch dim handled by one batched einsum per head.
    for h in range(NUM_HEADS):
        lo = h * HEAD_DIM
        qh = q[:, lo:lo + HEAD_DIM].reshape(BATCH, SEQ, HEAD_DIM)
        kh = k[:, lo:lo + HEAD_DIM].reshape(BATCH, SEQ, HEAD_DIM)
        vh = v[:, lo:lo + HEAD_DIM].reshape(BATCH, SEQ, HEAD_DIM)

        s = jnp.einsum("bqd,bkd->bqk", qh, kh,
                       preferred_element_type=jnp.float32) * scale      # [B, S, S]
        s = s + mask[:, None, :]
        s = s - jnp.max(s, axis=-1, keepdims=True)
        p = jnp.exp(s)
        p = p * pl.reciprocal(jnp.sum(p, axis=-1, keepdims=True), approx=True)

        ctx = jnp.einsum("bqk,bkd->bqd", p, vh,
                         preferred_element_type=jnp.float32)             # [B, S, D]
        ctx = ctx.reshape(BATCH * SEQ, HEAD_DIM)

        # Fold this head's context through its sublane rows of Wo; accumulating
        # here avoids a lane-concatenate of the per-head contexts.
        attn = attn + jnp.dot(ctx, wo[lo:lo + HEAD_DIM, :],
                              preferred_element_type=jnp.float32)

    attn = attn + vec[0:1, :]            # + bo

    # --- con1: LayerNorm(dropout(attn) + zeros)  (eval: dropout = identity) ---
    h1 = _layer_norm(attn, vec[1:2, :], vec[2:3, :])

    # --- MLP ---
    inter = _gelu(jnp.dot(h1, w1_ref[...], preferred_element_type=jnp.float32) + b1_ref[...])
    mlp = jnp.dot(inter, w2_ref[...], preferred_element_type=jnp.float32) + vec[3:4, :]

    # --- con2 ---
    # TODO(synk): at real sizes pad H to a multiple of 128 (or present a [B, S*H]
    # slab) so the final store is an unmasked full-lane vst.
    out_ref[...] = _layer_norm(mlp, vec[4:5, :], vec[5:6, :])


# ----------------------------- wrapper ---------------------------------------
def galaxy_bert_layer(x, add_mask, params):
    B, S, H = x.shape
    x_flat = x.reshape(B * S, H)

    # Pack parameters: fused QKV + one stacked [6, H] vector slab (bo, g1, be1, b2, g2, be2).
    w_qkv = jnp.concatenate([params["wq"], params["wk"], params["wv"]], axis=1)   # [H, 3H]
    b_qkv = jnp.concatenate([params["bq"], params["bk"], params["bv"]], axis=1)   # [1, 3H]
    vecs = jnp.concatenate([params["bo"], params["g1"], params["be1"],
                            params["b2"], params["g2"], params["be2"]], axis=0)   # [6, H]

    def full_spec(shape):
        return pl.BlockSpec(shape, lambda: (0,) * len(shape))

    in_specs = [
        full_spec((B * S, H)),            # x_flat
        full_spec((B, S)),                # additive mask
        full_spec((H, 3 * H)),            # W_qkv
        full_spec((1, 3 * H)),            # b_qkv
        full_spec((H, H)),                # Wo
        full_spec((H, INTERMEDIATE)),     # W1
        full_spec((1, INTERMEDIATE)),     # b1
        full_spec((INTERMEDIATE, H)),     # W2
        full_spec((6, H)),                # packed vectors
    ]

    out_flat = pl.pallas_call(
        galaxy_bert_layer_kernel,
        out_shape=jax.ShapeDtypeStruct((B * S, H), jnp.float32),
        in_specs=in_specs,
        out_specs=full_spec((B * S, H)),
    )(
        x_flat, add_mask,
        w_qkv, b_qkv,
        params["wo"],
        params["w1"], params["b1"], params["w2"],
        vecs,
    )
    return out_flat.reshape(B, S, H)


# ----------------------------- reference (pure JAX) ---------------------------
def galaxy_bert_layer_ref(x, add_mask, p):
    B, S, H = x.shape
    q = x @ p["wq"] + p["bq"]
    k = x @ p["wk"] + p["bk"]
    v = x @ p["wv"] + p["bv"]
    qh = q.reshape(B, S, NUM_HEADS, HEAD_DIM).transpose(0, 2, 1, 3)
    kh = k.reshape(B, S, NUM_HEADS, HEAD_DIM).transpose(0, 2, 1, 3)
    vh = v.reshape(B, S, NUM_HEADS, HEAD_DIM).transpose(0, 2, 1, 3)
    scores = jnp.einsum("bhqd,bhkd->bhqk", qh, kh) / math.sqrt(HEAD_DIM)
    scores = scores + add_mask[:, None, None, :]
    probs = jax.nn.softmax(scores, axis=-1)
    ctx = jnp.einsum("bhqk,bhkd->bhqd", probs, vh).transpose(0, 2, 1, 3).reshape(B, S, H)
    attn_out = ctx @ p["wo"] + p["bo"]
    h1 = _layer_norm(attn_out, p["g1"], p["be1"])
    inter = _gelu(h1 @ p["w1"] + p["b1"])
    mlp_out = inter @ p["w2"] + p["b2"]
    return _layer_norm(mlp_out, p["g2"], p["be2"])


# ----------------------------- main ------------------------------------------
if __name__ == "__main__":
    key = jax.random.PRNGKey(0)
    ks = jax.random.split(key, 16)

    def init(k, shape, scale=0.02):
        return (scale * jax.random.normal(k, shape)).astype(jnp.float32)

    params = {
        "wq": init(ks[0], (HIDDEN, HIDDEN)), "bq": init(ks[1], (1, HIDDEN)),
        "wk": init(ks[2], (HIDDEN, HIDDEN)), "bk": init(ks[3], (1, HIDDEN)),
        "wv": init(ks[4], (HIDDEN, HIDDEN)), "bv": init(ks[5], (1, HIDDEN)),
        "wo": init(ks[6], (HIDDEN, HIDDEN)), "bo": init(ks[7], (1, HIDDEN)),
        "g1": jnp.ones((1, HIDDEN), jnp.float32), "be1": jnp.zeros((1, HIDDEN), jnp.float32),
        "w1": init(ks[8], (HIDDEN, INTERMEDIATE)), "b1": init(ks[9], (1, INTERMEDIATE)),
        "w2": init(ks[10], (INTERMEDIATE, HIDDEN)), "b2": init(ks[11], (1, HIDDEN)),
        "g2": jnp.ones((1, HIDDEN), jnp.float32), "be2": jnp.zeros((1, HIDDEN), jnp.float32),
    }

    x = init(ks[12], (BATCH, SEQ, HIDDEN), scale=1.0)
    # attention mask: last two tokens of batch element 1 are padding
    token_mask = jnp.ones((BATCH, SEQ), jnp.float32).at[1, -2:].set(0.0)
    add_mask = (1.0 - token_mask) * -10000.0  # additive extended mask [B, S]

    out = galaxy_bert_layer(x, add_mask, params)
    out = jax.block_until_ready(out)

    ref = galaxy_bert_layer_ref(x, add_mask, params)
    assert out.shape == (BATCH, SEQ, HIDDEN)
    # tolerance 2e-3: pl.reciprocal(approx=True) softmax normalisation + tanh GELU
    assert jnp.allclose(out, ref, atol=2e-3, rtol=2e-3), "mismatch vs JAX reference"

    print("KERNEL_OK")
</pallas_src>

<mosaic_0001>
module attributes {stable_mosaic.version = 11 : i64} {
  func.func @galaxy_bert_layer_kernel(%arg0: memref<16x32xf32, #tpu.memory_space<vmem>>, %arg1: memref<2x8xf32, #tpu.memory_space<vmem>>, %arg2: memref<32x96xf32, #tpu.memory_space<vmem>>, %arg3: memref<1x96xf32, #tpu.memory_space<vmem>>, %arg4: memref<32x32xf32, #tpu.memory_space<vmem>>, %arg5: memref<32x64xf32, #tpu.memory_space<vmem>>, %arg6: memref<1x64xf32, #tpu.memory_space<vmem>>, %arg7: memref<64x32xf32, #tpu.memory_space<vmem>>, %arg8: memref<6x32xf32, #tpu.memory_space<vmem>>, %arg9: memref<16x32xf32, #tpu.memory_space<vmem>>) attributes {dimension_semantics = [], scalar_prefetch = 0 : i64, scratch_operands = 0 : i64, tpu.core_type = #tpu.core_type<tc>} {
    %c0 = arith.constant 0 : index
    %c0_0 = arith.constant 0 : index
    %0 = vector.load %arg0[%c0, %c0_0] : memref<16x32xf32, #tpu.memory_space<vmem>>, vector<16x32xf32>
    %c0_1 = arith.constant 0 : index
    %c0_2 = arith.constant 0 : index
    %1 = vector.load %arg1[%c0_1, %c0_2] : memref<2x8xf32, #tpu.memory_space<vmem>>, vector<2x8xf32>
    %c0_3 = arith.constant 0 : index
    %c0_4 = arith.constant 0 : index
    %2 = vector.load %arg8[%c0_3, %c0_4] : memref<6x32xf32, #tpu.memory_space<vmem>>, vector<6x32xf32>
    %c0_5 = arith.constant 0 : index
    %c0_6 = arith.constant 0 : index
    %3 = vector.load %arg4[%c0_5, %c0_6] : memref<32x32xf32, #tpu.memory_space<vmem>>, vector<32x32xf32>
    %c0_7 = arith.constant 0 : index
    %c0_8 = arith.constant 0 : index
    %4 = vector.load %arg2[%c0_7, %c0_8] : memref<32x96xf32, #tpu.memory_space<vmem>>, vector<32x96xf32>
    %cst = arith.constant dense<0.000000e+00> : vector<16x96xf32>
    %5 = tpu.matmul %0, %4, %cst {dimension_numbers = #tpu.dot_dimension_numbers<[1], [0], [0], [1], [0, 0, 1, 1], [], []>} : vector<16x32xf32>, vector<32x96xf32>, vector<16x96xf32> -> vector<16x96xf32>
    %c0_9 = arith.constant 0 : index
    %c0_10 = arith.constant 0 : index
    %6 = vector.load %arg3[%c0_9, %c0_10] : memref<1x96xf32, #tpu.memory_space<vmem>>, vector<1x96xf32>
    %7 = vector.broadcast %6 : vector<1x96xf32> to vector<16x96xf32>
    %8 = arith.addf %5, %7 : vector<16x96xf32>
    %9 = vector.extract_strided_slice %8 {offsets = [0, 0], sizes = [16, 32], strides = [1, 1]} : vector<16x96xf32> to vector<16x32xf32>
    %10 = vector.extract_strided_slice %8 {offsets = [0, 32], sizes = [16, 32], strides = [1, 1]} : vector<16x96xf32> to vector<16x32xf32>
    %11 = vector.extract_strided_slice %8 {offsets = [0, 64], sizes = [16, 32], strides = [1, 1]} : vector<16x96xf32> to vector<16x32xf32>
    %cst_11 = arith.constant 0.000000e+00 : f32
    %12 = vector.broadcast %cst_11 : f32 to vector<16x32xf32>
    %13 = vector.extract_strided_slice %9 {offsets = [0, 0], sizes = [16, 16], strides = [1, 1]} : vector<16x32xf32> to vector<16x16xf32>
    %14 = vector.shape_cast %13 : vector<16x16xf32> to vector<2x8x16xf32>
    %15 = vector.extract_strided_slice %10 {offsets = [0, 0], sizes = [16, 16], strides = [1, 1]} : vector<16x32xf32> to vector<16x16xf32>
    %16 = vector.shape_cast %15 : vector<16x16xf32> to vector<2x8x16xf32>
    %17 = vector.extract_strided_slice %11 {offsets = [0, 0], sizes = [16, 16], strides = [1, 1]} : vector<16x32xf32> to vector<16x16xf32>
    %18 = vector.shape_cast %17 : vector<16x16xf32> to vector<2x8x16xf32>
    "tpu.trace_start"() <{level = 10 : i32, message = "bqd,bkd->bqk"}> : () -> ()
    %cst_12 = arith.constant dense<0.000000e+00> : vector<2x8x8xf32>
    %19 = tpu.matmul %14, %16, %cst_12 {dimension_numbers = #tpu.dot_dimension_numbers<[2], [2], [1], [1], [0, 0, 0, 1, 1, 1], [0], [0]>} : vector<2x8x16xf32>, vector<2x8x16xf32>, vector<2x8x8xf32> -> vector<2x8x8xf32>
    "tpu.trace_stop"() : () -> ()
    %cst_13 = arith.constant 2.500000e-01 : f32
    %20 = vector.broadcast %cst_13 : f32 to vector<2x8x8xf32>
    %21 = arith.mulf %19, %20 : vector<2x8x8xf32>
    %22 = vector.shape_cast %1 : vector<2x8xf32> to vector<2x1x8xf32>
    %23 = vector.broadcast %22 : vector<2x1x8xf32> to vector<2x8x8xf32>
    %24 = arith.addf %21, %23 : vector<2x8x8xf32>
    %cst_14 = arith.constant dense<0xFF800000> : vector<2x8xf32>
    %25 = vector.multi_reduction <maximumf>, %24, %cst_14 [2] : vector<2x8x8xf32> to vector<2x8xf32>
    %26 = vector.shape_cast %25 : vector<2x8xf32> to vector<2x8x1xf32>
    %27 = vector.broadcast %26 : vector<2x8x1xf32> to vector<2x8x8xf32>
    %28 = arith.subf %24, %27 : vector<2x8x8xf32>
    %29 = math.exp %28 : vector<2x8x8xf32>
    %cst_15 = arith.constant dense<0.000000e+00> : vector<2x8xf32>
    %30 = vector.multi_reduction <add>, %29, %cst_15 [2] : vector<2x8x8xf32> to vector<2x8xf32>
    %31 = vector.shape_cast %30 : vector<2x8xf32> to vector<2x8x1xf32>
    %32 = tpu.reciprocal %31 {approx = true} : vector<2x8x1xf32> -> vector<2x8x1xf32>
    %33 = vector.broadcast %32 : vector<2x8x1xf32> to vector<2x8x8xf32>
    %34 = arith.mulf %29, %33 : vector<2x8x8xf32>
    "tpu.trace_start"() <{level = 10 : i32, message = "bqk,bkd->bqd"}> : () -> ()
    %cst_16 = arith.constant dense<0.000000e+00> : vector<2x8x16xf32>
    %35 = tpu.matmul %34, %18, %cst_16 {dimension_numbers = #tpu.dot_dimension_numbers<[2], [1], [1], [2], [0, 0, 0, 1, 1, 2], [0], [0]>} : vector<2x8x8xf32>, vector<2x8x16xf32>, vector<2x8x16xf32> -> vector<2x8x16xf32>
    "tpu.trace_stop"() : () -> ()
    %36 = vector.shape_cast %35 : vector<2x8x16xf32> to vector<16x16xf32>
    %37 = vector.extract_strided_slice %3 {offsets = [0, 0], sizes = [16, 32], strides = [1, 1]} : vector<32x32xf32> to vector<16x32xf32>
    %cst_17 = arith.constant dense<0.000000e+00> : vector<16x32xf32>
    %38 = tpu.matmul %36, %37, %cst_17 {dimension_numbers = #tpu.dot_dimension_numbers<[1], [0], [0], [1], [0, 0, 1, 1], [], []>} : vector<16x16xf32>, vector<16x32xf32>, vector<16x32xf32> -> vector<16x32xf32>
    %39 = arith.addf %12, %38 : vector<16x32xf32>
    %40 = vector.extract_strided_slice %9 {offsets = [0, 16], sizes = [16, 16], strides = [1, 1]} : vector<16x32xf32> to vector<16x16xf32>
    %41 = vector.shape_cast %40 : vector<16x16xf32> to vector<2x8x16xf32>
    %42 = vector.extract_strided_slice %10 {offsets = [0, 16], sizes = [16, 16], strides = [1, 1]} : vector<16x32xf32> to vector<16x16xf32>
    %43 = vector.shape_cast %42 : vector<16x16xf32> to vector<2x8x16xf32>
    %44 = vector.extract_strided_slice %11 {offsets = [0, 16], sizes = [16, 16], strides = [1, 1]} : vector<16x32xf32> to vector<16x16xf32>
    %45 = vector.shape_cast %44 : vector<16x16xf32> to vector<2x8x16xf32>
    "tpu.trace_start"() <{level = 10 : i32, message = "bqd,bkd->bqk"}> : () -> ()
    %cst_18 = arith.constant dense<0.000000e+00> : vector<2x8x8xf32>
    %46 = tpu.matmul %41, %43, %cst_18 {dimension_numbers = #tpu.dot_dimension_numbers<[2], [2], [1], [1], [0, 0, 0, 1, 1, 1], [0], [0]>} : vector<2x8x16xf32>, vector<2x8x16xf32>, vector<2x8x8xf32> -> vector<2x8x8xf32>
    "tpu.trace_stop"() : () -> ()
    %cst_19 = arith.constant 2.500000e-01 : f32
    %47 = vector.broadcast %cst_19 : f32 to vector<2x8x8xf32>
    %48 = arith.mulf %46, %47 : vector<2x8x8xf32>
    %49 = vector.shape_cast %1 : vector<2x8xf32> to vector<2x1x8xf32>
    %50 = vector.broadcast %49 : vector<2x1x8xf32> to vector<2x8x8xf32>
    %51 = arith.addf %48, %50 : vector<2x8x8xf32>
    %cst_20 = arith.constant dense<0xFF800000> : vector<2x8xf32>
    %52 = vector.multi_reduction <maximumf>, %51, %cst_20 [2] : vector<2x8x8xf32> to vector<2x8xf32>
    %53 = vector.shape_cast %52 : vector<2x8xf32> to vector<2x8x1xf32>
    %54 = vector.broadcast %53 : vector<2x8x1xf32> to vector<2x8x8xf32>
    %55 = arith.subf %51, %54 : vector<2x8x8xf32>
    %56 = math.exp %55 : vector<2x8x8xf32>
    %cst_21 = arith.constant dense<0.000000e+00> : vector<2x8xf32>
    %57 = vector.multi_reduction <add>, %56, %cst_21 [2] : vector<2x8x8xf32> to vector<2x8xf32>
    %58 = vector.shape_cast %57 : vector<2x8xf32> to vector<2x8x1xf32>
    %59 = tpu.reciprocal %58 {approx = true} : vector<2x8x1xf32> -> vector<2x8x1xf32>
    %60 = vector.broadcast %59 : vector<2x8x1xf32> to vector<2x8x8xf32>
    %61 = arith.mulf %56, %60 : vector<2x8x8xf32>
    "tpu.trace_start"() <{level = 10 : i32, message = "bqk,bkd->bqd"}> : () -> ()
    %cst_22 = arith.constant dense<0.000000e+00> : vector<2x8x16xf32>
    %62 = tpu.matmul %61, %45, %cst_22 {dimension_numbers = #tpu.dot_dimension_numbers<[2], [1], [1], [2], [0, 0, 0, 1, 1, 2], [0], [0]>} : vector<2x8x8xf32>, vector<2x8x16xf32>, vector<2x8x16xf32> -> vector<2x8x16xf32>
    "tpu.trace_stop"() : () -> ()
    %63 = vector.shape_cast %62 : vector<2x8x16xf32> to vector<16x16xf32>
    %64 = vector.extract_strided_slice %3 {offsets = [16, 0], sizes = [16, 32], strides = [1, 1]} : vector<32x32xf32> to vector<16x32xf32>
    %cst_23 = arith.constant dense<0.000000e+00> : vector<16x32xf32>
    %65 = tpu.matmul %63, %64, %cst_23 {dimension_numbers = #tpu.dot_dimension_numbers<[1], [0], [0], [1], [0, 0, 1, 1], [], []>} : vector<16x16xf32>, vector<16x32xf32>, vector<16x32xf32> -> vector<16x32xf32>
    %66 = arith.addf %39, %65 : vector<16x32xf32>
    %67 = vector.extract_strided_slice %2 {offsets = [0, 0], sizes = [1, 32], strides = [1, 1]} : vector<6x32xf32> to vector<1x32xf32>
    %68 = vector.broadcast %67 : vector<1x32xf32> to vector<16x32xf32>
    %69 = arith.addf %66, %68 : vector<16x32xf32>
    %70 = vector.extract_strided_slice %2 {offsets = [1, 0], sizes = [1, 32], strides = [1, 1]} : vector<6x32xf32> to vector<1x32xf32>
    %71 = vector.extract_strided_slice %2 {offsets = [2, 0], sizes = [1, 32], strides = [1, 1]} : vector<6x32xf32> to vector<1x32xf32>
    %cst_24 = arith.constant dense<0.000000e+00> : vector<16xf32>
    %72 = vector.multi_reduction <add>, %69, %cst_24 [1] : vector<16x32xf32> to vector<16xf32>
    %73 = vector.shape_cast %72 : vector<16xf32> to vector<16x1xf32>
    %cst_25 = arith.constant 3.200000e+01 : f32
    %74 = vector.broadcast %cst_25 : f32 to vector<16x1xf32>
    %75 = arith.divf %73, %74 : vector<16x1xf32>
    %76 = vector.broadcast %75 : vector<16x1xf32> to vector<16x32xf32>
    %77 = arith.subf %69, %76 : vector<16x32xf32>
    %78 = arith.mulf %77, %77 : vector<16x32xf32>
    %cst_26 = arith.constant dense<0.000000e+00> : vector<16xf32>
    %79 = vector.multi_reduction <add>, %78, %cst_26 [1] : vector<16x32xf32> to vector<16xf32>
    %80 = vector.shape_cast %79 : vector<16xf32> to vector<16x1xf32>
    %cst_27 = arith.constant 3.200000e+01 : f32
    %81 = vector.broadcast %cst_27 : f32 to vector<16x1xf32>
    %82 = arith.divf %80, %81 : vector<16x1xf32>
    %83 = vector.broadcast %75 : vector<16x1xf32> to vector<16x32xf32>
    %84 = arith.subf %69, %83 : vector<16x32xf32>
    %cst_28 = arith.constant 9.99999996E-13 : f32
    %85 = vector.broadcast %cst_28 : f32 to vector<16x1xf32>
    %86 = arith.addf %82, %85 : vector<16x1xf32>
    %87 = math.rsqrt %86 : vector<16x1xf32>
    %88 = vector.broadcast %87 : vector<16x1xf32> to vector<16x32xf32>
    %89 = arith.mulf %84, %88 : vector<16x32xf32>
    %90 = vector.broadcast %70 : vector<1x32xf32> to vector<16x32xf32>
    %91 = arith.mulf %89, %90 : vector<16x32xf32>
    %92 = vector.broadcast %71 : vector<1x32xf32> to vector<16x32xf32>
    %93 = arith.addf %91, %92 : vector<16x32xf32>
    %c0_29 = arith.constant 0 : index
    %c0_30 = arith.constant 0 : index
    %94 = vector.load %arg5[%c0_29, %c0_30] : memref<32x64xf32, #tpu.memory_space<vmem>>, vector<32x64xf32>
    %cst_31 = arith.constant dense<0.000000e+00> : vector<16x64xf32>
    %95 = tpu.matmul %93, %94, %cst_31 {dimension_numbers = #tpu.dot_dimension_numbers<[1], [0], [0], [1], [0, 0, 1, 1], [], []>} : vector<16x32xf32>, vector<32x64xf32>, vector<16x64xf32> -> vector<16x64xf32>
    %c0_32 = arith.constant 0 : index
    %c0_33 = arith.constant 0 : index
    %96 = vector.load %arg6[%c0_32, %c0_33] : memref<1x64xf32, #tpu.memory_space<vmem>>, vector<1x64xf32>
    %97 = vector.broadcast %96 : vector<1x64xf32> to vector<16x64xf32>
    %98 = arith.addf %95, %97 : vector<16x64xf32>
    %99 = arith.mulf %98, %98 : vector<16x64xf32>
    %100 = arith.mulf %98, %99 : vector<16x64xf32>
    %cst_34 = arith.constant 4.471500e-02 : f32
    %101 = vector.broadcast %cst_34 : f32 to vector<16x64xf32>
    %102 = arith.mulf %101, %100 : vector<16x64xf32>
    %103 = arith.addf %98, %102 : vector<16x64xf32>
    %cst_35 = arith.constant 0.797884583 : f32
    %104 = vector.broadcast %cst_35 : f32 to vector<16x64xf32>
    %105 = arith.mulf %104, %103 : vector<16x64xf32>
    %106 = math.tanh %105 : vector<16x64xf32>
    %cst_36 = arith.constant 1.000000e+00 : f32
    %107 = vector.broadcast %cst_36 : f32 to vector<16x64xf32>
    %108 = arith.addf %107, %106 : vector<16x64xf32>
    %cst_37 = arith.constant 5.000000e-01 : f32
    %109 = vector.broadcast %cst_37 : f32 to vector<16x64xf32>
    %110 = arith.mulf %109, %108 : vector<16x64xf32>
    %111 = arith.mulf %98, %110 : vector<16x64xf32>
    %c0_38 = arith.constant 0 : index
    %c0_39 = arith.constant 0 : index
    %112 = vector.load %arg7[%c0_38, %c0_39] : memref<64x32xf32, #tpu.memory_space<vmem>>, vector<64x32xf32>
    %cst_40 = arith.constant dense<0.000000e+00> : vector<16x32xf32>
    %113 = tpu.matmul %111, %112, %cst_40 {dimension_numbers = #tpu.dot_dimension_numbers<[1], [0], [0], [1], [0, 0, 1, 1], [], []>} : vector<16x64xf32>, vector<64x32xf32>, vector<16x32xf32> -> vector<16x32xf32>
    %114 = vector.extract_strided_slice %2 {offsets = [3, 0], sizes = [1, 32], strides = [1, 1]} : vector<6x32xf32> to vector<1x32xf32>
    %115 = vector.broadcast %114 : vector<1x32xf32> to vector<16x32xf32>
    %116 = arith.addf %113, %115 : vector<16x32xf32>
    %117 = vector.extract_strided_slice %2 {offsets = [4, 0], sizes = [1, 32], strides = [1, 1]} : vector<6x32xf32> to vector<1x32xf32>
    %118 = vector.extract_strided_slice %2 {offsets = [5, 0], sizes = [1, 32], strides = [1, 1]} : vector<6x32xf32> to vector<1x32xf32>
    %cst_41 = arith.constant dense<0.000000e+00> : vector<16xf32>
    %119 = vector.multi_reduction <add>, %116, %cst_41 [1] : vector<16x32xf32> to vector<16xf32>
    %120 = vector.shape_cast %119 : vector<16xf32> to vector<16x1xf32>
    %cst_42 = arith.constant 3.200000e+01 : f32
    %121 = vector.broadcast %cst_42 : f32 to vector<16x1xf32>
    %122 = arith.divf %120, %121 : vector<16x1xf32>
    %123 = vector.broadcast %122 : vector<16x1xf32> to vector<16x32xf32>
    %124 = arith.subf %116, %123 : vector<16x32xf32>
    %125 = arith.mulf %124, %124 : vector<16x32xf32>
    %cst_43 = arith.constant dense<0.000000e+00> : vector<16xf32>
    %126 = vector.multi_reduction <add>, %125, %cst_43 [1] : vector<16x32xf32> to vector<16xf32>
    %127 = vector.shape_cast %126 : vector<16xf32> to vector<16x1xf32>
    %cst_44 = arith.constant 3.200000e+01 : f32
    %128 = vector.broadcast %cst_44 : f32 to vector<16x1xf32>
    %129 = arith.divf %127, %128 : vector<16x1xf32>
    %130 = vector.broadcast %122 : vector<16x1xf32> to vector<16x32xf32>
    %131 = arith.subf %116, %130 : vector<16x32xf32>
    %cst_45 = arith.constant 9.99999996E-13 : f32
    %132 = vector.broadcast %cst_45 : f32 to vector<16x1xf32>
    %133 = arith.addf %129, %132 : vector<16x1xf32>
    %134 = math.rsqrt %133 : vector<16x1xf32>
    %135 = vector.broadcast %134 : vector<16x1xf32> to vector<16x32xf32>
    %136 = arith.mulf %131, %135 : vector<16x32xf32>
    %137 = vector.broadcast %117 : vector<1x32xf32> to vector<16x32xf32>
    %138 = arith.mulf %136, %137 : vector<16x32xf32>
    %139 = vector.broadcast %118 : vector<1x32xf32> to vector<16x32xf32>
    %140 = arith.addf %138, %139 : vector<16x32xf32>
    %c0_46 = arith.constant 0 : index
    %c0_47 = arith.constant 0 : index
    %141 = vector.load %arg9[%c0_46, %c0_47] : memref<16x32xf32, #tpu.memory_space<vmem>>, vector<16x32xf32>
    tpu.vector_store %arg9[%c0_46, %c0_47], %140 {strides = array<i32>} : memref<16x32xf32, #tpu.memory_space<vmem>>, vector<16x32xf32>,
    return
  }
}

</mosaic_0001>

<bundles_post_ra>
// kernel: tpu_custom_call.1
= control target key start
LH: loop header
LB: loop body
LE: loop exit
PB: predicated region body
PF: predicated region fallthrough
CT: control target
= control target key end

     0   :  { %14 = vsyncpa [#allocation3], 0  ;;  %s1071_s0 = inlined_call_operand.hbm [shape: f32[16,32], index: 0, kind: input, shape index: {}]   ;;  %s1072_s1 = inlined_call_operand.hbm [shape: f32[2,8], index: 1, kind: input, shape index: {}]   ;;  %s1073_s2 = inlined_call_operand.vmem [shape: f32[32,96], index: 2, kind: input, shape index: {}]   ;;  %s1074_s3 = inlined_call_operand.vmem [shape: f32[1,96], index: 3, kind: input, shape index: {}]   ;;  %s1075_s4 = inlined_call_operand.vmem [shape: f32[32,32], index: 4, kind: input, shape index: {}]   ;;  %s1076_s5 = inlined_call_operand.vmem [shape: f32[32,64], index: 5, kind: input, shape index: {}]   ;;  %s1077_s6 = inlined_call_operand.vmem [shape: f32[1,64], index: 6, kind: input, shape index: {}]   ;;  %s1078_s7 = inlined_call_operand.vmem [shape: f32[64,32], index: 7, kind: input, shape index: {}]   ;;  %s1079_s8 = inlined_call_operand.hbm [shape: f32[6,32], index: 8, kind: input, shape index: {}]   ;;  %s1080_s9 = inlined_call_operand.hbm [shape: f32[16,32], index: 9, kind: output, shape index: {}]  }
   0x1   :  { %15 = vsyncpa [#allocation6], 0  ;;  %s35_s11 = sshll.u32 %s1072_s1, 4  ;;  %s36_s11 = int_to_ptr.hbm [resolvable:$true] %s35_s11 }
   0x2   :  { %16 = vsyncpa [#allocation4], 0  ;;  %s853_s12 = smov [#allocation5]   ;;  %s21_s16 = sshll.u32 %s1071_s0, 4  ;;  %s22_s16 = int_to_ptr.hbm [resolvable:$true] %s21_s16 }
   0x3   :  { %s37_s13 = sshll.u32 %s853_s12, 4  ;;  %s854_s17 = smov [#allocation2]   ;;  %s38_s13 = int_to_ptr.vmem [resolvable:$true] %s37_s13 }
   0x4   :  { %40 = dma.hbm_to_vmem [thread:$0]  %s36_s11, 32, %s38_s13, [#allocation6]  }
   0x5   :  { %s23_s18 = sshll.u32 %s854_s17, 4  ;;  %s855_s19 = smov 128   ;;  %s24_s18 = int_to_ptr.vmem [resolvable:$true] %s23_s18 }
   0x6   :  { %s856_s20 = smov 8   ;;  %s58_s22 = sshll.u32 %s1079_s8, 4  ;;  %s59_s22 = int_to_ptr.hbm [resolvable:$true] %s58_s22 }
   0x7   :  { %29 = dma.hbm_to_vmem [thread:$0]  %s22_s16, 256, %s24_s18, [#allocation3], %s855_s19, %s855_s19, %s856_s20  }
   0x8   :  { %s857_s23 = smov [#allocation7]  }
   0x9   :  { %s60_s24 = sshll.u32 %s857_s23, 4  ;;  %s61_s24 = int_to_ptr.vmem [resolvable:$true] %s60_s24 }
   0xa   :  { %63 = dma.hbm_to_vmem [thread:$0]  %s59_s22, 128, %s61_s24, [#allocation6]  }
   0xb   :  { %847 = dma.done.wait [#allocation3], 256  }
   0xc   :  { %848 = vsyncadd [#allocation3], 4294967040 }
   0xd   :  { %849 = dma.done.wait [#allocation6], 160  }
   0xe   :  { %850 = vsyncadd [#allocation6], 4294967136  ;;  %v87_v0 = vld [vmem:[%s1073_s2 + $0x18] sm:$0xff]  ;;  %v86_v1 = vld [vmem:[%s1073_s2 + $0x10] sm:$0xff]  ;;  %vm92_vm0 = vcmask 261120   ;;  %s858_s12 = smov 80  }
   0xf   :  { %111 = vmatpush.msra.mxu0 %v87_v0  ;;  %v85_v2 = vld [vmem:[%s1073_s2 + $0x8] sm:$0xff]  ;;  %v84_v3 = vld [vmem:[%s1073_s2] sm:$0xff]  ;;  %s859_s2 = smov 96   ;;  %s860_s13 = smov 112   ;;  %vm125_vm1 = vcmask 130048   ;;  %vm187_vm2 = vcmask 64512  }
  0x10   :  { %v76_v4 = vld [vmem:[#allocation2] sm:$0xff]  ;;  %v77_v5 = vld [vmem:[#allocation2 + $0x8] sm:$0xff]  ;;  %v78_v17 = vld [vmem:[#allocation5] sm:$0x3]  ;;  %s862_s14 = smov 48   ;;  %vm578_vm10 = vcmask 523264  }
  0x11   :  { %112 = vmatpush.msra.mxu0 %v86_v1  ;;  %v719_v6 = vld [vmem:[%s1074_s3] ss:$0 sm:$0xff]  ;;  %v181_v18 = vperm.slane %v78_v17, 0  ;;  %v180_v26 = vrot.slane %v78_v17, 1  ;;  %s861_s3 = smov 64   ;;  %v81_v62 = vld [vmem:[%s1075_s4 + $0x8] sm:$0xff] }
  0x12   :  { %s666_s0 = sshll.u32 %s1080_s9, 4  ;;  %s667_s0 = int_to_ptr.hbm [resolvable:$true] %s666_s0 }
  0x13   :  { %113 = vmatpush.msra.mxu0 %v85_v2  ;;  %v182_v28 = vperm.slane %v180_v26, 0 }
  0x15   :  { %114 = vmatpush.msra.mxu0 %v84_v3 }
  0x16   :  { %680 = vmatmul.msk.f32.vlgmr.msra.gmra.mxu0 %vm92_vm0, %v76_v4 }
  0x17   :  { %445 = vmatpush.msrb.mxu0 %v81_v62 }
  0x1e   :  { %681 = vmatmul.msk.f32.gmra.mxu0 %vm92_vm0, %v77_v5 }
  0x93   :  { %v116_v7 = vpop.f32.mrf.mxu0 }
  0x94   :  { %v944_v8 = vadd.f32 %v719_v6, %v116_v7 }
  0x96   :  { %264 = vrot.lane.b32.xlu1 %v944_v8, %s858_s12  ;;  %123 = vrot.lane.b32.xlu0 %v944_v8, %s859_s2 }
  0x9b   :  { %v119_v9 = vpop.f32.mrf.mxu0 }
  0x9c   :  { %v948_v10 = vadd.f32 %v719_v6, %v119_v9 }
  0x9e   :  { %292 = vrot.lane.b32.xlu2 %v948_v10, %s858_s12  ;;  %262 = vrot.lane.b32.xlu1 %v944_v8, %s860_s13  ;;  %v714_v37 = vpack.i.bf16 %v948_v10, %v944_v8 }
  0x9f   :  { %151 = vrot.lane.b32.xlu0 %v948_v10, %s859_s2 }
  0xa6   :  { %290 = vrot.lane.b32.xlu2 %v948_v10, %s860_s13 }
  0xf8   :  { %v293_v15 = vpop.permute.xlu2 %292 }
 0x100   :  { %v291_v16 = vpop.permute.xlu2 %290 }
 0x108   :  { %v265_v11 = vpop.permute.xlu1 %264  ;;  %v124_v12 = vpop.permute.xlu0 %123 }
 0x109   :  { %682 = vmatpush.xpose.msk.msra.mxu2 %vm125_vm1, %v124_v12  ;;  %688 = vmatpush.xpose.msk.msra.mxu1 %vm125_vm1, %v265_v11  ;;  %v80_v12 = vld [vmem:[%s1075_s4] sm:$0xff] }
 0x10a   :  { %446 = vmatpush.msrb.mxu0 %v80_v12 }
 0x10c   :  { %683 = vmatmul.msk.f32.vlgmr.msra.gmra.mxu2 %vm125_vm1, %v944_v8 }
 0x110   :  { %v263_v13 = vpop.permute.xlu1 %262 }
 0x111   :  { %v152_v14 = vpop.permute.xlu0 %151  ;;  %689 = vmatmul.msk.f32.vlgmr.msra.gmra.mxu1 %vm125_vm1, %v263_v13  ;;  %v83_v13 = vld [vmem:[%s1075_s4 + $0x18] sm:$0xff] }
 0x112   :  { %684 = vmatpush.xpose.msk.msrb.mxu2 %vm125_vm1, %v152_v14  ;;  %v82_v14 = vld [vmem:[%s1075_s4 + $0x10] sm:$0xff] }
 0x115   :  { %685 = vmatmul.msk.f32.vlgmr.msrb.gmra.mxu2 %vm125_vm1, %v948_v10 }
 0x116   :  { %690 = vmatpush.xpose.msk.msra.mxu2 %vm125_vm1, %v293_v15 }
 0x11a   :  { %416 = vmatpush.msrb.mxu2 %v83_v13 }
 0x11c   :  { %417 = vmatpush.msrb.mxu2 %v82_v14 }
 0x11d   :  { %691 = vmatmul.msk.f32.vlgmr.msra.gmra.mxu2 %vm125_vm1, %v291_v16 }
 0x18e   :  { %v287_v19 = vpop.f32.mrf.mxu1 }
 0x18f   :  { %v318_v20 = vmul.f32 0.25, %v287_v19  ;;  %v147_v21 = vpop.f32.mrf.mxu2  ;;  %v996_v19 = vld [vmem:[#allocation7] sm:$0x3f] }
 0x190   :  { %v177_v22 = vmul.f32 0.25, %v147_v21  ;;  %v454_v21 = vperm.slane %v996_v19, 0 }
 0x191   :  { %v320_v23 = vadd.f32 %v318_v20, %v181_v18 }
 0x192   :  { %v185_v24 = vadd.f32 %v181_v18, %v177_v22 }
 0x193   :  { %v322_v25 = vsel %vm187_vm2, %v320_v23, -inf }
 0x194   :  { %323 = vmax.xlane.f32.xlu2 %v322_v25  ;;  %v188_v27 = vsel %vm187_vm2, %v185_v24, -inf }
 0x195   :  { %189 = vmax.xlane.f32.xlu0 %v188_v27 }
 0x198   :  { %v174_v29 = vpop.f32.mrf.mxu2 }
 0x199   :  { %v178_v30 = vmul.f32 0.25, %v174_v29 }
 0x19b   :  { %v186_v31 = vadd.f32 %v182_v28, %v178_v30 }
 0x19d   :  { %v191_v32 = vsel %vm187_vm2, %v186_v31, -inf }
 0x19e   :  { %192 = vmax.xlane.f32.xlu1 %v191_v32 }
 0x1a0   :  { %v315_v33 = vpop.f32.mrf.mxu2 }
 0x1a1   :  { %v319_v34 = vmul.f32 0.25, %v315_v33 }
 0x1a3   :  { %v321_v35 = vadd.f32 %v319_v34, %v182_v28 }
 0x1a5   :  { %v325_v36 = vsel %vm187_vm2, %v321_v35, -inf }
 0x1a6   :  { %326 = vmax.xlane.f32.xlu2 %v325_v36 }
 0x1be   :  { %715 = vrot.lane.b32.xlu2 %v714_v37, %s861_s3 }
 0x207   :  { %v324_v38 = vpop.xlane.xlu2 %323 }
 0x208   :  { %v328_v39 = vsub.f32 %v320_v23, %v324_v38  ;;  %v190_v40 = vpop.xlane.xlu0 %189 }
 0x209   :  { %v194_v42 = vsub.f32 %v185_v24, %v190_v40 }
 0x20a   :  { %v330_v41 = vmul.f32 1.442695, %v328_v39 }
 0x20b   :  { %v196_v43 = vmul.f32 1.442695, %v194_v42 }
 0x20c   :  { %721 = vpow2.f32 %v330_v41 }
 0x20d   :  { %723 = vpow2.f32 %v196_v43 }
 0x211   :  { %v193_v44 = vpop.xlane.xlu1 %192 }
 0x212   :  { %v722_v45 = vpop.eup %721  ;;  %v195_v46 = vsub.f32 %v186_v31, %v193_v44  ;;  %v863_v31 = vmov 32.0  }
 0x213   :  { %v334_v47 = vsel %vm187_vm2, %v722_v45, 0.0  ;;  %v724_v49 = vpop.eup %723 }
 0x214   :  { %v198_v48 = vmul.f32 1.442695, %v195_v46  ;;  %335 = vadd.xlane.f32.xlu0 %v334_v47  ;;  %v200_v52 = vsel %vm187_vm2, %v724_v49, 0.0 }
 0x216   :  { %725 = vpow2.f32 %v198_v48  ;;  %v517_v48 = vld [vmem:[%s1076_s5 + $0x18] sm:$0xff] }
 0x219   :  { %v327_v50 = vpop.xlane.xlu2 %326 }
 0x21a   :  { %v329_v51 = vsub.f32 %v321_v35, %v327_v50  ;;  %v515_v50 = vld [vmem:[%s1076_s5 + $0x8] sm:$0xff] }
 0x21c   :  { %v726_v53 = vpop.eup %725  ;;  %v332_v54 = vmul.f32 1.442695, %v329_v51  ;;  %201 = vadd.xlane.f32.xlu0 %v200_v52  ;;  %v514_v51 = vld [vmem:[%s1076_s5] sm:$0xff] }
 0x21d   :  { %v203_v55 = vsel %vm187_vm2, %v726_v53, 0.0 }
 0x21e   :  { %727 = vpow2.f32 %v332_v54  ;;  %204 = vadd.xlane.f32.xlu1 %v203_v55 }
 0x221   :  { %v716_v56 = vpop.permute.xlu2 %715 }
 0x222   :  { %v717_v57 = vunpack.i.l.bf16 %v716_v56  ;;  %v718_v58 = vunpack.i.h.bf16 %v716_v56 }
 0x224   :  { %v728_v59 = vpop.eup %727  ;;  %231 = vmatpush.msra.mxu3 %v717_v57 }
 0x225   :  { %v337_v60 = vsel %vm187_vm2, %v728_v59, 0.0 }
 0x226   :  { %257 = vmatpush.msrb.mxu3 %v718_v58  ;;  %338 = vadd.xlane.f32.xlu0 %v337_v60 }
 0x237   :  { %344 = vrot.lane.b32.xlu1 %v944_v8, %s862_s14 }
 0x23a   :  { %370 = vrot.lane.b32.xlu0 %v948_v10, %s862_s14 }
 0x287   :  { %v336_v61 = vpop.xlane.xlu0 %335 }
 0x28f   :  { %v202_v63 = vpop.xlane.xlu0 %201 }
 0x290   :  { %729 = vrcp.f32 %v202_v63 }
 0x291   :  { %v205_v0 = vpop.xlane.xlu1 %204 }
 0x292   :  { %731 = vrcp.f32 %v205_v0 }
 0x293   :  { %733 = vrcp.f32 %v336_v61 }
 0x296   :  { %v730_v1 = vpop.eup %729 }
 0x297   :  { %v208_v2 = vmul.f32 %v730_v1, %v724_v49  ;;  %v516_v49 = vld [vmem:[%s1076_s5 + $0x10] sm:$0xff] }
 0x298   :  { %v732_v3 = vpop.eup %731 }
 0x299   :  { %686 = vmatmul.msk.f32.vlgmr.msra.gmra.mxu3 %vm187_vm2, %v208_v2  ;;  %v209_v4 = vmul.f32 %v732_v3, %v726_v53  ;;  %v339_v5 = vpop.xlane.xlu0 %338  ;;  %v734_v6 = vpop.eup %733  ;;  %v508_v2 = vperm.slane %v996_v19, 1 }
 0x29a   :  { %735 = vrcp.f32 %v339_v5  ;;  %v342_v8 = vmul.f32 %v734_v6, %v722_v45  ;;  %v511_v6 = vperm.slane %v996_v19, 2 }
 0x29b   :  { %737 = vrcp.f32 %v863_v31 }
 0x2a0   :  { %v736_v7 = vpop.eup %735 }
 0x2a1   :  { %687 = vmatmul.msk.f32.vlgmr.msrb.gmra.mxu3 %vm187_vm2, %v209_v4  ;;  %v343_v11 = vmul.f32 %v736_v7, %v728_v59  ;;  %v738_v32 = vpop.eup %737 }
 0x2a2   :  { %v464_v33 = vmul.f32 32.0, %v738_v32  ;;  %vm468_vm3 = vweird.f32 %v738_v32 }
 0x2a4   :  { %v465_v34 = vsub.f32 1.0, %v464_v33 }
 0x2a6   :  { %v466_v35 = vmul.f32 %v738_v32, %v465_v34 }
 0x2a8   :  { %v467_v36 = vadd.f32 %v738_v32, %v466_v35 }
 0x2a9   :  { %v345_v9 = vpop.permute.xlu1 %344 }
 0x2aa   :  { %365 = vmatpush.msra.mxu3 %v345_v9  ;;  %v1001_v37 = vsel %vm468_vm3, %v738_v32, %v467_v36 }
 0x2ab   :  { %692 = vmatmul.msk.f32.vlgmr.msra.gmra.mxu3 %vm187_vm2, %v342_v8 }
 0x2ac   :  { %v371_v10 = vpop.permute.xlu0 %370  ;;  %540 = vmatpush.msrb.mxu3 %v517_v48 }
 0x2ad   :  { %391 = vmatpush.msrb.mxu1 %v371_v10 }
 0x2ae   :  { %693 = vmatmul.msk.f32.vlgmr.msrb.gmra.mxu1 %vm187_vm2, %v343_v11  ;;  %541 = vmatpush.msrb.mxu3 %v516_v49  ;;  %v577_v49 = vperm.slane %v996_v19, 3 }
 0x2b0   :  { %542 = vmatpush.msrb.mxu3 %v515_v50 }
 0x2b2   :  { %543 = vmatpush.msrb.mxu3 %v514_v51 }
 0x31c   :  { %v233_v15 = vpop.f32.mrf.mxu3 }
 0x31d   :  { %696 = vmatmul.msk.f32.vlgmr.msrb.gmra.mxu0 %vm125_vm1, %v233_v15 }
 0x324   :  { %v259_v16 = vpop.f32.mrf.mxu3 }
 0x325   :  { %697 = vmatmul.msk.f32.gmra.mxu0 %vm125_vm1, %v259_v16  ;;  %v576_v16 = vld [vmem:[%s1078_s7 + $0x38] sm:$0xff] }
 0x326   :  { %593 = vmatpush.msra.mxu1 %v576_v16  ;;  %v652_v16 = vperm.slane %v996_v19, 4 }
 0x32b   :  { %v393_v18 = vpop.f32.mrf.mxu1 }
 0x32e   :  { %v367_v17 = vpop.f32.mrf.mxu3 }
 0x32f   :  { %694 = vmatmul.msk.f32.vlgmr.msrb.gmra.mxu2 %vm125_vm1, %v367_v17  ;;  %v575_v17 = vld [vmem:[%s1078_s7 + $0x30] sm:$0xff] }
 0x330   :  { %594 = vmatpush.msra.mxu1 %v575_v17 }
 0x337   :  { %695 = vmatmul.msk.f32.gmra.mxu2 %vm125_vm1, %v393_v18  ;;  %v574_v18 = vld [vmem:[%s1078_s7 + $0x28] sm:$0xff] }
 0x338   :  { %595 = vmatpush.msra.mxu1 %v574_v18 }
 0x39a   :  { %v448_v20 = vpop.f32.mrf.mxu0 }
 0x3a2   :  { %v451_v26 = vpop.f32.mrf.mxu0 }
 0x3b2   :  { %v419_v22 = vpop.f32.mrf.mxu2 }
 0x3b3   :  { %v449_v23 = vadd.f32 %v448_v20, %v419_v22  ;;  %v573_v20 = vld [vmem:[%s1078_s7 + $0x20] sm:$0xff]  ;;  %v571_v22 = vld [vmem:[%s1078_s7 + $0x10] sm:$0xff] }
 0x3b4   :  { %596 = vmatpush.msra.mxu1 %v573_v20 }
 0x3b5   :  { %v455_v24 = vadd.f32 %v454_v21, %v449_v23  ;;  %v570_v23 = vld [vmem:[%s1078_s7 + $0x8] sm:$0xff] }
 0x3b7   :  { %v457_v25 = vsel %vm92_vm0, %v455_v24, 0.0 }
 0x3b8   :  { %458 = vadd.xlane.f32.xlu2 %v457_v25  ;;  %v720_v25 = vld [vmem:[%s1077_s6] ss:$0 sm:$0xff]  ;;  %s864_s6 = smov [#allocation8]  }
 0x3ba   :  { %v422_v27 = vpop.f32.mrf.mxu2 }
 0x3bb   :  { %v452_v28 = vadd.f32 %v451_v26, %v422_v27 }
 0x3bd   :  { %v456_v29 = vadd.f32 %v454_v21, %v452_v28  ;;  %v572_v21 = vld [vmem:[%s1078_s7 + $0x18] sm:$0xff] }
 0x3be   :  { %597 = vmatpush.msra.mxu1 %v572_v21 }
 0x3bf   :  { %v460_v30 = vsel %vm92_vm0, %v456_v29, 0.0 }
 0x3c0   :  { %461 = vadd.xlane.f32.xlu1 %v460_v30  ;;  %598 = vmatpush.msra.mxu1 %v571_v22 }
 0x3c2   :  { %599 = vmatpush.msra.mxu1 %v570_v23 }
 0x42b   :  { %v459_v38 = vpop.xlane.xlu2 %458 }
 0x42c   :  { %v470_v39 = vmul.f32 %v1001_v37, %v459_v38 }
 0x42e   :  { %v472_v40 = vsub.f32 %v455_v24, %v470_v39  ;;  %v569_v24 = vld [vmem:[%s1078_s7] sm:$0xff]  ;;  %s664_s7 = sshll.u32 %s864_s6, 4  ;;  %s665_s7 = int_to_ptr.vmem [resolvable:$true] %s664_s7 }
 0x42f   :  { %600 = vmatpush.msra.mxu1 %v569_v24 }
 0x430   :  { %v474_v41 = vmul.f32 %v472_v40, %v472_v40 }
 0x432   :  { %v476_v42 = vsel %vm92_vm0, %v474_v41, 0.0 }
 0x433   :  { %477 = vadd.xlane.f32.xlu0 %v476_v42  ;;  %v462_v43 = vpop.xlane.xlu1 %461 }
 0x434   :  { %v471_v44 = vmul.f32 %v1001_v37, %v462_v43 }
 0x436   :  { %v473_v45 = vsub.f32 %v456_v29, %v471_v44 }
 0x438   :  { %v475_v46 = vmul.f32 %v473_v45, %v473_v45 }
 0x43a   :  { %v479_v47 = vsel %vm92_vm0, %v475_v46, 0.0 }
 0x43b   :  { %480 = vadd.xlane.f32.xlu2 %v479_v47 }
 0x4a6   :  { %v478_v52 = vpop.xlane.xlu0 %477 }
 0x4a7   :  { %v482_v53 = vmul.f32 %v478_v52, %v1001_v37 }
 0x4a9   :  { %v484_v54 = vadd.f32 1e-12, %v482_v53 }
 0x4ab   :  { %739 = vrsqrt.f32 %v484_v54  ;;  %vm492_vm5 = vweird.f32 %v484_v54 }
 0x4ae   :  { %v481_v55 = vpop.xlane.xlu2 %480 }
 0x4af   :  { %v483_v56 = vmul.f32 %v481_v55, %v1001_v37 }
 0x4b1   :  { %v740_v57 = vpop.eup %739  ;;  %v485_v58 = vadd.f32 1e-12, %v483_v56 }
 0x4b2   :  { %v487_v59 = vmul.f32 %v740_v57, %v484_v54  ;;  %vm493_vm4 = vweird.f32 %v740_v57 }
 0x4b3   :  { %741 = vrsqrt.f32 %v485_v58  ;;  %vm494_vm6 = vmor %vm492_vm5, %vm493_vm4  ;;  %vm502_vm8 = vweird.f32 %v485_v58 }
 0x4b4   :  { %v488_v60 = vmul.f32 %v740_v57, %v487_v59 }
 0x4b6   :  { %v489_v61 = vmul.f32 0.5, %v488_v60 }
 0x4b8   :  { %v490_v62 = vsub.f32 1.5, %v489_v61 }
 0x4b9   :  { %v742_v63 = vpop.eup %741 }
 0x4ba   :  { %v491_v0 = vmul.f32 %v740_v57, %v490_v62  ;;  %v497_v1 = vmul.f32 %v742_v63, %v485_v58  ;;  %vm503_vm7 = vweird.f32 %v742_v63 }
 0x4bb   :  { %vm504_vm9 = vmor %vm502_vm8, %vm503_vm7 }
 0x4bc   :  { %v495_v3 = vsel %vm494_vm6, %v740_v57, %v491_v0  ;;  %v498_v4 = vmul.f32 %v742_v63, %v497_v1 }
 0x4bd   :  { %v506_v5 = vmul.f32 %v495_v3, %v472_v40 }
 0x4be   :  { %v499_v7 = vmul.f32 0.5, %v498_v4 }
 0x4bf   :  { %v509_v8 = vmul.f32 %v508_v2, %v506_v5 }
 0x4c0   :  { %v500_v9 = vsub.f32 1.5, %v499_v7 }
 0x4c1   :  { %v512_v10 = vadd.f32 %v511_v6, %v509_v8 }
 0x4c2   :  { %v501_v11 = vmul.f32 %v742_v63, %v500_v9 }
 0x4c3   :  { %698 = vmatmul.msk.f32.vlgmr.msrb.gmra.mxu3 %vm92_vm0, %v512_v10 }
 0x4c4   :  { %v505_v12 = vsel %vm504_vm9, %v742_v63, %v501_v11 }
 0x4c5   :  { %v507_v13 = vmul.f32 %v505_v12, %v473_v45 }
 0x4c7   :  { %v510_v14 = vmul.f32 %v508_v2, %v507_v13 }
 0x4c9   :  { %v513_v15 = vadd.f32 %v511_v6, %v510_v14 }
 0x4cb   :  { %699 = vmatmul.msk.f32.gmra.mxu3 %vm92_vm0, %v513_v15 }
 0x546   :  { %v545_v26 = vpop.f32.mrf.mxu3 }
 0x547   :  { %v546_v27 = vadd.f32 %v720_v25, %v545_v26 }
 0x549   :  { %v551_v28 = vmul.f32 %v546_v27, %v546_v27 }
 0x54b   :  { %v553_v29 = vmul.f32 %v551_v28, %v546_v27 }
 0x54d   :  { %v555_v30 = vmul.f32 0.044715, %v553_v29 }
 0x54e   :  { %v548_v31 = vpop.f32.mrf.mxu3 }
 0x54f   :  { %v557_v32 = vadd.f32 %v555_v30, %v546_v27  ;;  %v549_v33 = vadd.f32 %v720_v25, %v548_v31 }
 0x551   :  { %v559_v34 = vmul.f32 0.7978846, %v557_v32  ;;  %v552_v35 = vmul.f32 %v549_v33, %v549_v33 }
 0x553   :  { %743 = vtanh.f32 %v559_v34  ;;  %v554_v36 = vmul.f32 %v552_v35, %v549_v33 }
 0x555   :  { %v556_v38 = vmul.f32 0.044715, %v554_v36 }
 0x557   :  { %v558_v39 = vadd.f32 %v556_v38, %v549_v33 }
 0x559   :  { %v744_v40 = vpop.eup %743  ;;  %v560_v41 = vmul.f32 0.7978846, %v558_v39 }
 0x55a   :  { %v563_v42 = vadd.f32 1.0, %v744_v40 }
 0x55b   :  { %745 = vtanh.f32 %v560_v41 }
 0x55c   :  { %v565_v43 = vmul.f32 0.5, %v563_v42 }
 0x55e   :  { %v567_v44 = vmul.f32 %v565_v43, %v546_v27 }
 0x560   :  { %700 = vmatmul.msk.f32.vlgmr.msra.gmra.mxu1 %vm578_vm10, %v567_v44 }
 0x561   :  { %v746_v45 = vpop.eup %745 }
 0x562   :  { %v564_v46 = vadd.f32 1.0, %v746_v45 }
 0x564   :  { %v566_v47 = vmul.f32 0.5, %v564_v46 }
 0x566   :  { %v568_v48 = vmul.f32 %v566_v47, %v549_v33 }
 0x568   :  { %701 = vmatmul.msk.f32.gmra.mxu1 %vm578_vm10, %v568_v48 }
 0x5dd   :  { %v602_v50 = vpop.f32.mrf.mxu1 }
 0x5de   :  { %v603_v51 = vadd.f32 %v602_v50, %v577_v49 }
 0x5e0   :  { %v608_v52 = vsel %vm92_vm0, %v603_v51, 0.0 }
 0x5e1   :  { %609 = vadd.xlane.f32.xlu1 %v608_v52 }
 0x5e5   :  { %v605_v53 = vpop.f32.mrf.mxu1 }
 0x5e6   :  { %v606_v54 = vadd.f32 %v605_v53, %v577_v49 }
 0x5e8   :  { %v611_v55 = vsel %vm92_vm0, %v606_v54, 0.0 }
 0x5e9   :  { %612 = vadd.xlane.f32.xlu2 %v611_v55 }
 0x654   :  { %v610_v56 = vpop.xlane.xlu1 %609 }
 0x655   :  { %v614_v57 = vmul.f32 %v610_v56, %v1001_v37 }
 0x657   :  { %v616_v58 = vsub.f32 %v603_v51, %v614_v57 }
 0x659   :  { %v618_v59 = vmul.f32 %v616_v58, %v616_v58 }
 0x65b   :  { %v620_v60 = vsel %vm92_vm0, %v618_v59, 0.0 }
 0x65c   :  { %v613_v61 = vpop.xlane.xlu2 %612  ;;  %621 = vadd.xlane.f32.xlu1 %v620_v60 }
 0x65d   :  { %v615_v62 = vmul.f32 %v613_v61, %v1001_v37 }
 0x65f   :  { %v617_v63 = vsub.f32 %v606_v54, %v615_v62 }
 0x661   :  { %v619_v0 = vmul.f32 %v617_v63, %v617_v63 }
 0x663   :  { %v623_v1 = vsel %vm92_vm0, %v619_v0, 0.0 }
 0x664   :  { %624 = vadd.xlane.f32.xlu0 %v623_v1 }
 0x6cf   :  { %v622_v2 = vpop.xlane.xlu1 %621 }
 0x6d0   :  { %v626_v3 = vmul.f32 %v622_v2, %v1001_v37 }
 0x6d2   :  { %v628_v4 = vadd.f32 1e-12, %v626_v3 }
 0x6d4   :  { %747 = vrsqrt.f32 %v628_v4  ;;  %vm636_vm12 = vweird.f32 %v628_v4 }
 0x6d7   :  { %v625_v5 = vpop.xlane.xlu0 %624 }
 0x6d8   :  { %v627_v6 = vmul.f32 %v625_v5, %v1001_v37  ;;  %v655_v37 = vperm.slane %v996_v19, 5 }
 0x6da   :  { %v748_v7 = vpop.eup %747  ;;  %v629_v8 = vadd.f32 1e-12, %v627_v6 }
 0x6db   :  { %v631_v9 = vmul.f32 %v748_v7, %v628_v4  ;;  %vm637_vm11 = vweird.f32 %v748_v7 }
 0x6dc   :  { %749 = vrsqrt.f32 %v629_v8  ;;  %vm638_vm13 = vmor %vm636_vm12, %vm637_vm11  ;;  %vm646_vm15 = vweird.f32 %v629_v8 }
 0x6dd   :  { %v632_v10 = vmul.f32 %v748_v7, %v631_v9 }
 0x6df   :  { %v633_v11 = vmul.f32 0.5, %v632_v10 }
 0x6e1   :  { %v634_v12 = vsub.f32 1.5, %v633_v11 }
 0x6e2   :  { %v750_v13 = vpop.eup %749 }
 0x6e3   :  { %v635_v14 = vmul.f32 %v748_v7, %v634_v12  ;;  %v641_v15 = vmul.f32 %v750_v13, %v629_v8  ;;  %vm647_vm14 = vweird.f32 %v750_v13 }
 0x6e4   :  { %vm648_vm1 = vmor %vm646_vm15, %vm647_vm14 }
 0x6e5   :  { %v639_v17 = vsel %vm638_vm13, %v748_v7, %v635_v14  ;;  %v642_v18 = vmul.f32 %v750_v13, %v641_v15 }
 0x6e6   :  { %v650_v20 = vmul.f32 %v639_v17, %v616_v58 }
 0x6e7   :  { %v643_v21 = vmul.f32 0.5, %v642_v18 }
 0x6e8   :  { %v653_v22 = vmul.f32 %v652_v16, %v650_v20 }
 0x6e9   :  { %v644_v23 = vsub.f32 1.5, %v643_v21 }
 0x6ea   :  { %v656_v24 = vadd.f32 %v655_v37, %v653_v22 }
 0x6eb   :  { %v645_v25 = vmul.f32 %v750_v13, %v644_v23 }
 0x6ec   :  { %658 = vst.msk [vmem:[#allocation8] sm:$0xff] %vm92_vm0, %v656_v24 }
 0x6ed   :  { %v649_v26 = vsel %vm648_vm1, %v750_v13, %v645_v25 }
 0x6ee   :  { %v651_v27 = vmul.f32 %v649_v26, %v617_v63 }
 0x6f0   :  { %v654_v28 = vmul.f32 %v652_v16, %v651_v27 }
 0x6f2   :  { %v657_v19 = vadd.f32 %v655_v37, %v654_v28 }
 0x6f4   :  { %659 = vst.msk [vmem:[#allocation8 + $0x8] sm:$0xff] %vm92_vm0, %v657_v19 }
 0x6f5   :  { %672 = dma.vmem_to_hbm [thread:$0]  %s665_s7, 256, %s667_s0, [#allocation4], %s855_s19, %s855_s19, %s856_s20  }
 0x6f6   :  { %851 = dma.done.wait [#allocation4], 256  }
 0x6f7   :  { %852 = vsyncadd [#allocation4], 4294967040 }
 0x6f8   :  { %677 = vsyncpa [#allocation3], 1 }
 0x6f9   :  { %678 = vsyncpa [#allocation6], 1 }
 0x6fa   :  { %679 = vsyncpa [#allocation4], 1 }

</bundles_post_ra>
